<compile_context>
chip_gen: v6e
topology: v6e:2x2x1
jax: 0.10.0
libtpu: 0.0.40
codegen_flags: <defaults>
</compile_context>

<pallas_src>
import functools

import jax
import jax.numpy as jnp
from jax.experimental import pallas as pl
from jax.experimental.pallas import tpu as pltpu

_LANE = 128
_MAX_BLOCK_ROWS = 1024  # 1024 x 128 f32 = 512 KiB per input block


def _bce_sum_kernel(pred_ref, gt_ref, out_ref, acc_ref, *,
                    n_valid, block_rows, mask_tail):
    """Accumulates sum of -(g*log(p) + (1-g)*log(1-p)) over all grid steps."""
    i = pl.program_id(0)

    @pl.when(i == 0)
    def _():
        acc_ref[...] = jnp.zeros_like(acc_ref)

    p = pred_ref[...].astype(jnp.float32)
    g = gt_ref[...].astype(jnp.float32)

    # PyTorch BCELoss clamps each log term at -100 for numerical stability.
    log_p = jnp.maximum(jnp.log(p), jnp.float32(-100.0))
    log_1mp = jnp.maximum(jnp.log(1.0 - p), jnp.float32(-100.0))
    # Algebraically identical to -(g*log_p + (1-g)*log_1mp), one fewer multiply.
    loss = -(log_1mp + g * (log_p - log_1mp))

    if mask_tail:  # trace-time flag: only emitted when a ragged tail exists
        row = jax.lax.broadcasted_iota(jnp.int32, loss.shape, 0) + i * block_rows
        lane = jax.lax.broadcasted_iota(jnp.int32, loss.shape, 1)
        full_rows = n_valid // _LANE
        tail = n_valid % _LANE
        valid = (row < full_rows) | ((row == full_rows) & (lane < tail))
        loss = jnp.where(valid, loss, jnp.float32(0.0))

    # Elementwise VPU add into the resident VMEM accumulator (hidden under DMA).
    acc_ref[...] += loss

    @pl.when(i == pl.num_programs(0) - 1)
    def _():
        # Single cross-lane reduce, paid once at the end.
        out_ref[0, 0] = jnp.sum(acc_ref[...])


def bce_loss(pred, gt):
    """Mean BCE over all elements; matches nn.BCELoss(size_average=True)."""
    assert pred.shape == gt.shape
    n = int(pred.size)

    flat_p = pred.reshape(-1)
    flat_g = gt.reshape(-1)

    # Only pad when n is not a multiple of the lane width (padded values are
    # masked in-kernel, so the pad constant is irrelevant).
    rem = n % _LANE
    if rem:
        pad = _LANE - rem
        flat_p = jnp.pad(flat_p, (0, pad))
        flat_g = jnp.pad(flat_g, (0, pad))

    rows = flat_p.shape[0] // _LANE
    p2 = flat_p.reshape(rows, _LANE)
    g2 = flat_g.reshape(rows, _LANE)

    # Large row-blocks; if the whole slab fits in one block, use the full
    # extent (always a legal block shape). Otherwise 1024 rows (multiple of 8).
    block_rows = min(_MAX_BLOCK_ROWS, rows)
    grid = (pl.cdiv(rows, block_rows),)

    # Mask only needed if the grid covers more elements than actually exist.
    covered = grid[0] * block_rows * _LANE
    mask_tail = covered != n

    kernel = functools.partial(
        _bce_sum_kernel, n_valid=n, block_rows=block_rows, mask_tail=mask_tail)

    total = pl.pallas_call(
        kernel,
        out_shape=jax.ShapeDtypeStruct((1, 1), jnp.float32),
        grid_spec=pltpu.PrefetchScalarGridSpec(
            num_scalar_prefetch=0,
            grid=grid,
            in_specs=[
                pl.BlockSpec((block_rows, _LANE), lambda i: (i, 0)),
                pl.BlockSpec((block_rows, _LANE), lambda i: (i, 0)),
            ],
            out_specs=pl.BlockSpec((1, 1), lambda i: (0, 0),
                                   memory_space=pltpu.SMEM),
            scratch_shapes=[pltpu.VMEM((block_rows, _LANE), jnp.float32)],
        ),
        compiler_params=pltpu.CompilerParams(
            dimension_semantics=("arbitrary",)),
    )(p2, g2)

    return total[0, 0] / jnp.float32(n)


if __name__ == "__main__":
    key = jax.random.PRNGKey(0)
    k1, k2 = jax.random.split(key)

    # Segmentation-style inputs: NCHW, batch=2, channels=4, spatial=16x16.
    shape = (2, 4, 16, 16)
    pred = jax.nn.sigmoid(jax.random.normal(k1, shape, dtype=jnp.float32))
    gt = (jax.random.uniform(k2, shape) > 0.5).astype(jnp.float32)

    out = bce_loss(pred, gt)
    out = jax.block_until_ready(out)

    # reference check (plain JAX)
    ref = jnp.mean(-(gt * jnp.maximum(jnp.log(pred), -100.0)
                     + (1.0 - gt) * jnp.maximum(jnp.log(1.0 - pred), -100.0)))
    assert jnp.allclose(out, ref, rtol=1e-5, atol=1e-6), (out, ref)

    print("KERNEL_OK")
</pallas_src>

<mosaic_0001>
module attributes {stable_mosaic.version = 11 : i64} {
  func.func @_bce_sum_kernel(%arg0: i32, %arg1: memref<16x128xf32, #tpu.memory_space<vmem>>, %arg2: memref<16x128xf32, #tpu.memory_space<vmem>>, %arg3: memref<1x1xf32, #tpu.memory_space<smem>>, %arg4: memref<16x128xf32, #tpu.memory_space<vmem>>) attributes {dimension_semantics = [#tpu.dimension_semantics<arbitrary>], iteration_bounds = array<i64: 1>, scalar_prefetch = 0 : i64, scratch_operands = 1 : i64, tpu.core_type = #tpu.core_type<tc>, window_params = [{transform_indices = @transform_0, window_bounds = array<i64: 16, 128>}, {transform_indices = @transform_1, window_bounds = array<i64: 16, 128>}, {transform_indices = @transform_2, window_bounds = array<i64: 1, 1>}]} {
    %c0_i32 = arith.constant 0 : i32
    %0 = arith.cmpi eq, %arg0, %c0_i32 : i32
    %1 = arith.extui %0 : i1 to i32
    %c0_i32_0 = arith.constant 0 : i32
    %2 = arith.cmpi ne, %1, %c0_i32_0 : i32
    scf.if %2 {
      %cst_13 = arith.constant 0.000000e+00 : f32
      %24 = vector.broadcast %cst_13 : f32 to vector<16x128xf32>
      %c0_14 = arith.constant 0 : index
      %c0_15 = arith.constant 0 : index
      %25 = vector.load %arg4[%c0_14, %c0_15] : memref<16x128xf32, #tpu.memory_space<vmem>>, vector<16x128xf32>
      tpu.vector_store %arg4[%c0_14, %c0_15], %24 {strides = array<i32>} : memref<16x128xf32, #tpu.memory_space<vmem>>, vector<16x128xf32>,
    } else {
    }
    %c0 = arith.constant 0 : index
    %c0_1 = arith.constant 0 : index
    %3 = vector.load %arg1[%c0, %c0_1] : memref<16x128xf32, #tpu.memory_space<vmem>>, vector<16x128xf32>
    %c0_2 = arith.constant 0 : index
    %c0_3 = arith.constant 0 : index
    %4 = vector.load %arg2[%c0_2, %c0_3] : memref<16x128xf32, #tpu.memory_space<vmem>>, vector<16x128xf32>
    %5 = math.log %3 : vector<16x128xf32>
    %cst = arith.constant -1.000000e+02 : f32
    %6 = vector.broadcast %cst : f32 to vector<16x128xf32>
    %7 = arith.maximumf %5, %6 : vector<16x128xf32>
    %cst_4 = arith.constant 1.000000e+00 : f32
    %8 = vector.broadcast %cst_4 : f32 to vector<16x128xf32>
    %9 = arith.subf %8, %3 : vector<16x128xf32>
    %10 = math.log %9 : vector<16x128xf32>
    %cst_5 = arith.constant -1.000000e+02 : f32
    %11 = vector.broadcast %cst_5 : f32 to vector<16x128xf32>
    %12 = arith.maximumf %10, %11 : vector<16x128xf32>
    %13 = arith.subf %7, %12 : vector<16x128xf32>
    %14 = arith.mulf %4, %13 : vector<16x128xf32>
    %15 = arith.addf %12, %14 : vector<16x128xf32>
    %cst_6 = arith.constant 0.000000e+00 : f32
    %16 = vector.broadcast %cst_6 : f32 to vector<16x128xf32>
    %17 = arith.subf %16, %15 : vector<16x128xf32>
    %c0_7 = arith.constant 0 : index
    %c0_8 = arith.constant 0 : index
    %18 = vector.load %arg4[%c0_7, %c0_8] : memref<16x128xf32, #tpu.memory_space<vmem>>, vector<16x128xf32>
    %19 = arith.addf %18, %17 : vector<16x128xf32>
    %c0_9 = arith.constant 0 : index
    %c0_10 = arith.constant 0 : index
    %20 = vector.load %arg4[%c0_9, %c0_10] : memref<16x128xf32, #tpu.memory_space<vmem>>, vector<16x128xf32>
    tpu.vector_store %arg4[%c0_9, %c0_10], %19 {strides = array<i32>} : memref<16x128xf32, #tpu.memory_space<vmem>>, vector<16x128xf32>,
    %c0_i32_11 = arith.constant 0 : i32
    %21 = arith.cmpi eq, %arg0, %c0_i32_11 : i32
    %22 = arith.extui %21 : i1 to i32
    %c0_i32_12 = arith.constant 0 : i32
    %23 = arith.cmpi ne, %22, %c0_i32_12 : i32
    scf.if %23 {
      %c0_13 = arith.constant 0 : index
      %c0_14 = arith.constant 0 : index
      %24 = vector.load %arg4[%c0_13, %c0_14] : memref<16x128xf32, #tpu.memory_space<vmem>>, vector<16x128xf32>
      %25 = vector.shape_cast %24 : vector<16x128xf32> to vector<1x16x128xf32>
      %cst_15 = arith.constant dense<0.000000e+00> : vector<1xf32>
      %26 = vector.multi_reduction <add>, %25, %cst_15 [1, 2] : vector<1x16x128xf32> to vector<1xf32>
      %27 = vector.shape_cast %26 : vector<1xf32> to vector<1x1x1xf32>
      %28 = vector.extract %27[0, 0, 0] : f32 from vector<1x1x1xf32>
      %c0_16 = arith.constant 0 : index
      %c0_17 = arith.constant 0 : index
      %29 = memref.load %arg3[%c0_16, %c0_17] : memref<1x1xf32, #tpu.memory_space<smem>>
      memref.store %28, %arg3[%c0_16, %c0_17] : memref<1x1xf32, #tpu.memory_space<smem>>
    } else {
    }
    return
  }
  func.func @transform_0(%arg0: i32) -> (i32, i32) {
    %c0_i32 = arith.constant 0 : i32
    %c0_i32_0 = arith.constant 0 : i32
    return %arg0, %c0_i32 : i32, i32
  }
  func.func @transform_1(%arg0: i32) -> (i32, i32) {
    %c0_i32 = arith.constant 0 : i32
    %c0_i32_0 = arith.constant 0 : i32
    return %arg0, %c0_i32 : i32, i32
  }
  func.func @transform_2(%arg0: i32) -> (i32, i32) {
    %c0_i32 = arith.constant 0 : i32
    %c0_i32_0 = arith.constant 0 : i32
    %c0_i32_1 = arith.constant 0 : i32
    return %c0_i32, %c0_i32_0 : i32, i32
  }
}

</mosaic_0001>

<bundles_post_ra>
// kernel: tpu_custom_call.1
= control target key start
LH: loop header
LB: loop body
LE: loop exit
PB: predicated region body
PF: predicated region fallthrough
CT: control target
= control target key end

     0   :  { %7 = vsyncpa [#allocation4], 0  ;;  %s208_s0 = inlined_call_operand.hbm [shape: f32[16,128], index: 0, kind: input, shape index: {}]   ;;  %s209_s1 = inlined_call_operand.hbm [shape: f32[16,128], index: 1, kind: input, shape index: {}]   ;;  %s210_s2 = inlined_call_operand.hbm [shape: f32[1,1], index: 2, kind: output, shape index: {}]  }
   0x1   :  { %8 = vsyncpa [#allocation7], 0 }
   0x2   :  { %9 = vsyncpa [#allocation5], 0  ;;  %s179_s9 = smov [#allocation3]  }
   0x3   :  { %s15_s10 = sshll.u32 %s179_s9, 4  ;;  %s16_s10 = int_to_ptr.vmem [resolvable:$true] %s15_s10 }
   0x4   :  { %s133_s11 = scalar_lea.vmem %s16_s10, 256  ;;  %p138_p1 = scmp.lt.s32.totalorder %s16_s10, %s16_s10 }
   0x5   :  { %p134_p0 = scmp.ne.s32.totalorder %s16_s10, %s133_s11  ;;  %p139_p2 = scmp.lt.s32.totalorder %s133_s11, %s133_s11 }
   0x7   :  { %p140_p3 = por %p139_p2, %p138_p1 }
   0x9   :  { %p141_p4 = pnand %p140_p3, %p134_p0 }
   0xb   :  { %144 = shalt.err (!%p141_p4)
}
   0xc   :  { %s180_s12 = smov 128   ;;  %s181_s13 = smov 8  }
   0xd   :  { %21 = dma.hbm_to_vmem [thread:$0]  %s208_s0, 256, %s16_s10, [#allocation4], %s180_s12, %s180_s12, %s181_s13  }
   0xe   :  { %s182_s16 = smov [#allocation6]  }
   0xf   :  { %s27_s17 = sshll.u32 %s182_s16, 4  ;;  %s28_s17 = int_to_ptr.vmem [resolvable:$true] %s27_s17 }
  0x10   :  { %s153_s18 = scalar_lea.vmem %s28_s17, 256  ;;  %p158_p6 = scmp.lt.s32.totalorder %s28_s17, %s28_s17 }
  0x11   :  { %p154_p5 = scmp.ne.s32.totalorder %s28_s17, %s153_s18  ;;  %p159_p7 = scmp.lt.s32.totalorder %s153_s18, %s153_s18 }
  0x13   :  { %p160_p8 = por %p159_p7, %p158_p6 }
  0x15   :  { %p161_p9 = pnand %p160_p8, %p154_p5 }
  0x17   :  { %164 = shalt.err (!%p161_p9)
}
  0x18   :  { %33 = dma.hbm_to_vmem [thread:$0]  %s209_s1, 256, %s28_s17, [#allocation7], %s180_s12, %s180_s12, %s181_s13  }
  0x19   :  { %173 = dma.done.wait [#allocation4], 256  }
  0x1a   :  { %174 = vsyncadd [#allocation4], 4294967040 }
  0x1b   :  { %175 = dma.done.wait [#allocation7], 256  }
  0x1c   :  { %176 = vsyncadd [#allocation7], 4294967040  ;;  %v46_v0 = vld [vmem:[#allocation3] sm:$0xff]  ;;  %v47_v1 = vld [vmem:[#allocation3 + $0x8] sm:$0xff]  ;;  %s183_s1 = smov [#allocation8]  }
  0x1d   :  { %117 = vlog2.f32 %v46_v0  ;;  %v56_v2 = vsub.f32 1.0, %v46_v0  ;;  %v57_v3 = vsub.f32 1.0, %v47_v1  ;;  %v48_v15 = vld [vmem:[#allocation6] sm:$0xff]  ;;  %v49_v17 = vld [vmem:[#allocation6 + $0x8] sm:$0xff] }
  0x1e   :  { %119 = vlog2.f32 %v47_v1 }
  0x1f   :  { %121 = vlog2.f32 %v56_v2 }
  0x20   :  { %123 = vlog2.f32 %v57_v3 }
  0x2a   :  { %v118_v4 = vpop.eup %117 }
  0x2b   :  { %v120_v5 = vpop.eup %119  ;;  %v51_v6 = vmul.f32 0.6931472, %v118_v4 }
  0x2c   :  { %v122_v7 = vpop.eup %121  ;;  %v53_v8 = vmul.f32 0.6931472, %v120_v5 }
  0x2d   :  { %v124_v9 = vpop.eup %123  ;;  %v54_v10 = vmax.f32 %v51_v6, -100.0  ;;  %v59_v11 = vmul.f32 0.6931472, %v122_v7 }
  0x2e   :  { %v55_v12 = vmax.f32 %v53_v8, -100.0  ;;  %v61_v13 = vmul.f32 0.6931472, %v124_v9 }
  0x2f   :  { %v62_v14 = vmax.f32 %v59_v11, -100.0 }
  0x30   :  { %v63_v16 = vmax.f32 %v61_v13, -100.0 }
  0x31   :  { %v64_v18 = vsub.f32 %v54_v10, %v62_v14 }
  0x32   :  { %v65_v19 = vsub.f32 %v55_v12, %v63_v16 }
  0x33   :  { %v66_v20 = vmul.f32 %v64_v18, %v48_v15 }
  0x34   :  { %v67_v21 = vmul.f32 %v65_v19, %v49_v17 }
  0x35   :  { %v68_v22 = vadd.f32 %v66_v20, %v62_v14 }
  0x36   :  { %v69_v23 = vadd.f32 %v67_v21, %v63_v16 }
  0x37   :  { %v70_v24 = vsub.f32 0.0, %v68_v22 }
  0x38   :  { %v71_v25 = vsub.f32 0.0, %v69_v23 }
  0x3a   :  { %v83_v26 = vadd.f32 %v71_v25, %v70_v24 }
  0x3c   :  { %84 = vadd.xlane.f32.xlu0 %v83_v26 }
  0xc5   :  { %v85_v27 = vpop.xlane.xlu0 %84 }
  0xc6   :  { %v86_v28 = vrot.slane %v85_v27, 4 }
  0xc8   :  { %v87_v29 = vadd.f32 %v86_v28, %v85_v27 }
  0xca   :  { %v88_v30 = vrot.slane %v87_v29, 2 }
  0xcc   :  { %v89_v31 = vadd.f32 %v88_v30, %v87_v29 }
  0xce   :  { %v90_v32 = vrot.slane %v89_v31, 1 }
  0xd0   :  { %v91_v33 = vadd.f32 %v90_v32, %v89_v31 }
  0xd2   :  { %110 = vpush %v91_v33 }
 0x103   :  { %s111_s0 = spop %110 }
 0x104   :  { %94 = sst [smem:[#allocation8]] %s111_s0 }
 0x105   :  { %102 = dma.smem_to_hbm %s183_s1, 16, %s210_s2, [#allocation5]  }
 0x106   :  { %177 = dma.done.wait [#allocation5], 16  }
 0x107   :  { %178 = vsyncadd [#allocation5], 4294967280 }
 0x108   :  { %106 = sfence }
 0x109   :  { %107 = vsyncpa [#allocation4], 1 }
 0x10a   :  { %108 = vsyncpa [#allocation7], 1 }
 0x10b   :  { %109 = vsyncpa [#allocation5], 1 }

</bundles_post_ra>
